<compile_context>
chip_gen: v5e
topology: v5e:2x2
jax: 0.10.0
libtpu: 0.0.40
codegen_flags: <defaults>
</compile_context>

<pallas_src>
import numpy as np
import jax
import jax.numpy as jnp
from jax.experimental import pallas as pl
from jax.experimental.pallas import tpu as pltpu

# ---------------- small, module-consistent shapes ----------------
SEQ   = 8     # s_len
BATCH = 8     # n_batch
VOCAB = 50
EMB   = 16    # embeddings.embedding_size
HID   = 32    # hidden_size (num_directions = 1)
# NOTE: at real sizes pick HID a multiple of 128 (lane-dense stores) and
# B >= 128 (v5e) / >= 256 (v6e/v7x) so the recurrent matmul fills MXU rows.


# ---------------- Pallas kernel: full LSTM recurrence, one grid step / core --
def lstm_kernel(gx_ref,      # (S, Bb, 4H) precomputed  x_t @ W_ih^T + b  slab
                whh_ref,     # (H, 4H)     recurrent weight (pre-transposed)
                out_ref,     # (S, Bb, H)  memory bank (VMEM-resident block)
                cn_ref):     # (Bb, H)     final cell state
    S, Bb, _ = gx_ref.shape
    H = whh_ref.shape[0]

    # Load the recurrent weight once; reused across every unrolled step.
    whh = whh_ref[...]

    # hidden=None in the PyTorch module -> zero initial state.
    h = jnp.zeros((Bb, H), jnp.float32)
    c = jnp.zeros((Bb, H), jnp.float32)

    def step(t, h, c):
        # gates = (x_t @ W_ih^T + b_ih + b_hh) + h_{t-1} @ W_hh^T   (Bb, 4H)
        gates = gx_ref[t] + jnp.dot(h, whh, preferred_element_type=jnp.float32)

        # PyTorch gate order [i, f, g, o].  Sigmoid over the full vreg (i/f/o
        # need 3 of its 4 lane groups); tanh only on the g slice (EUP trim).
        sig = jax.nn.sigmoid(gates)
        i_g = sig[:, 0 * H:1 * H]
        f_g = sig[:, 1 * H:2 * H]
        o_g = sig[:, 3 * H:4 * H]
        g_g = jnp.tanh(gates[:, 2 * H:3 * H])

        c = f_g * c + i_g * g_g
        h = o_g * jnp.tanh(c)

        # VMEM store; HBM writeback of the whole (S,Bb,H) block is one DMA.
        out_ref[t] = h.astype(out_ref.dtype)
        return h, c

    if S <= 16:
        # Small, static trip count: full unroll gives LLO full visibility.
        for t in range(S):
            h, c = step(t, h, c)
    else:
        # Long sequences: bound live ranges / code size, keep some unroll.
        h, c = jax.lax.fori_loop(0, S, lambda t, hc: step(t, *hc), (h, c),
                                 unroll=4)

    cn_ref[...] = c.astype(cn_ref.dtype)


# ---------------- one-time parameter preparation (hoisted out of forward) ----
def prepare_params(emb_table, w_ih, w_hh, b_ih, b_hh):
    """Fold embedding + input projection + biases into a projected table.

    proj_table[v] = emb_table[v] @ W_ih^T + (b_ih + b_hh)    -> (VOCAB, 4H)
    whh_t         = W_hh^T                                   -> (H, 4H)
    Done once per parameter set, not per forward call.
    """
    proj_table = (emb_table.astype(jnp.float32)
                  @ w_ih.T.astype(jnp.float32)
                  + (b_ih + b_hh)[None, :].astype(jnp.float32))
    whh_t = jnp.asarray(w_hh.T, jnp.float32)
    return proj_table, whh_t


# ---------------- forward: lengths=None, hidden=None path --------------------
def rnn_encoder_forward(input_ids, proj_table, whh_t):
    """RNNEncoder.forward with lengths=None, hidden=None.

    input_ids  : int32 (S, B, 1)
    proj_table : f32 (VOCAB, 4H)   -- from prepare_params
    whh_t      : f32 (H, 4H)       -- from prepare_params
    returns    : ((h_n, c_n) each (1, B, H), outputs (S, B, H))
    """
    S, B, _ = input_ids.shape
    H4 = proj_table.shape[1]
    H = H4 // 4

    # Folded embedding/input-projection: one gather, no separate activation
    # slab or per-forward input matmul.
    gx = proj_table[input_ids[..., 0]]                          # (S, B, 4H)

    # Megacore batch split (v7x has 2 TCs); pointless at tiny B, so gated.
    BB = 2 if (B >= 256 and B % 2 == 0) else 1
    Bb = B // BB

    # Scoped-VMEM budget: resident blocks x double-buffering, with headroom,
    # capped below v7x's 64 MiB physical VMEM.
    resident_bytes = 4 * (S * Bb * H4 + H * H4 + S * Bb * H + Bb * H)
    vmem_limit = int(min(64 << 20, max(16 << 20, 4 * resident_bytes)))

    outputs, c_n = pl.pallas_call(
        lstm_kernel,
        grid=(BB,),
        out_shape=(
            jax.ShapeDtypeStruct((S, B, H), jnp.float32),       # memory bank
            jax.ShapeDtypeStruct((B, H), jnp.float32),          # c_n
        ),
        in_specs=[
            pl.BlockSpec((S, Bb, H4), lambda i: (0, i, 0)),     # gate slab
            pl.BlockSpec((H, H4), lambda i: (0, 0)),            # W_hh^T
        ],
        out_specs=(
            pl.BlockSpec((S, Bb, H), lambda i: (0, i, 0)),
            pl.BlockSpec((Bb, H), lambda i: (i, 0)),
        ),
        compiler_params=pltpu.CompilerParams(
            dimension_semantics=("parallel",),
            vmem_limit_bytes=vmem_limit),
    )(gx, whh_t)

    # h_n is exactly the last-step output: slice in the wrapper instead of
    # paying for an extra padded sub-tile kernel output.
    h_n = outputs[-1]
    hidden_t = (h_n[None], c_n[None])   # (num_layers*num_directions, B, H)
    return hidden_t, outputs


# ---------------- pure-JAX reference (for correctness check) -----------------
def lstm_reference(emb, w_ih, w_hh, b_ih, b_hh):
    S, B, _ = emb.shape
    H = w_hh.shape[1]

    def step(carry, x_t):
        h, c = carry
        gates = x_t @ w_ih.T + h @ w_hh.T + b_ih + b_hh
        i = jax.nn.sigmoid(gates[:, 0 * H:1 * H])
        f = jax.nn.sigmoid(gates[:, 1 * H:2 * H])
        g = jnp.tanh(gates[:, 2 * H:3 * H])
        o = jax.nn.sigmoid(gates[:, 3 * H:4 * H])
        c = f * c + i * g
        h = o * jnp.tanh(c)
        return (h, c), h

    (h_n, c_n), outs = jax.lax.scan(
        step, (jnp.zeros((B, H), jnp.float32), jnp.zeros((B, H), jnp.float32)),
        emb)
    return (h_n[None], c_n[None]), outs


if __name__ == "__main__":
    key = jax.random.PRNGKey(0)
    k_ids, k_emb, k_wih, k_whh, k_bih, k_bhh = jax.random.split(key, 6)

    # input: LongTensor (len, batch, nfeat=1)
    input_ids = jax.random.randint(k_ids, (SEQ, BATCH, 1), 0, VOCAB,
                                   dtype=jnp.int32)

    # deterministic parameter init
    # (nn.Embedding ~ N(0,1); nn.LSTM ~ U(-1/sqrt(H), 1/sqrt(H)))
    emb_table = jax.random.normal(k_emb, (VOCAB, EMB), jnp.float32)
    bound = 1.0 / np.sqrt(HID)
    w_ih = jax.random.uniform(k_wih, (4 * HID, EMB), jnp.float32, -bound, bound)
    w_hh = jax.random.uniform(k_whh, (4 * HID, HID), jnp.float32, -bound, bound)
    b_ih = jax.random.uniform(k_bih, (4 * HID,), jnp.float32, -bound, bound)
    b_hh = jax.random.uniform(k_bhh, (4 * HID,), jnp.float32, -bound, bound)

    # one-time parameter preparation (per review: hoisted out of forward)
    proj_table, whh_t = prepare_params(emb_table, w_ih, w_hh, b_ih, b_hh)

    (h_n, c_n), outputs = jax.block_until_ready(
        rnn_encoder_forward(input_ids, proj_table, whh_t))

    # verify against pure-JAX LSTM reference
    emb = emb_table[input_ids[..., 0]]
    (h_ref, c_ref), out_ref = lstm_reference(emb, w_ih, w_hh, b_ih, b_hh)
    np.testing.assert_allclose(np.asarray(outputs), np.asarray(out_ref),
                               atol=1e-5, rtol=1e-5)
    np.testing.assert_allclose(np.asarray(h_n), np.asarray(h_ref),
                               atol=1e-5, rtol=1e-5)
    np.testing.assert_allclose(np.asarray(c_n), np.asarray(c_ref),
                               atol=1e-5, rtol=1e-5)

    assert outputs.shape == (SEQ, BATCH, HID)
    assert h_n.shape == (1, BATCH, HID) and c_n.shape == (1, BATCH, HID)
    print("KERNEL_OK")
</pallas_src>

<mosaic_0001>
module attributes {stable_mosaic.version = 11 : i64} {
  func.func @lstm_kernel(%arg0: i32, %arg1: memref<8x8x128xf32, #tpu.memory_space<vmem>>, %arg2: memref<32x128xf32, #tpu.memory_space<vmem>>, %arg3: memref<8x8x32xf32, #tpu.memory_space<vmem>>, %arg4: memref<8x32xf32, #tpu.memory_space<vmem>>) attributes {dimension_semantics = [#tpu.dimension_semantics<parallel>], iteration_bounds = array<i64: 1>, scalar_prefetch = 0 : i64, scratch_operands = 0 : i64, tpu.core_type = #tpu.core_type<tc>, window_params = [{transform_indices = @transform_0, window_bounds = array<i64: 8, 8, 128>}, {pipeline_mode = #tpu.pipeline_mode<synchronous>, transform_indices = @transform_1, window_bounds = array<i64: 32, 128>}, {transform_indices = @transform_2, window_bounds = array<i64: 8, 8, 32>}, {transform_indices = @transform_3, window_bounds = array<i64: 8, 32>}]} {
    %c0 = arith.constant 0 : index
    %c0_0 = arith.constant 0 : index
    %0 = vector.load %arg2[%c0, %c0_0] : memref<32x128xf32, #tpu.memory_space<vmem>>, vector<32x128xf32>
    %cst = arith.constant 0.000000e+00 : f32
    %1 = vector.broadcast %cst : f32 to vector<8x32xf32>
    %cst_1 = arith.constant 0.000000e+00 : f32
    %2 = vector.broadcast %cst_1 : f32 to vector<8x32xf32>
    %c0_2 = arith.constant 0 : index
    %c0_3 = arith.constant 0 : index
    %c0_4 = arith.constant 0 : index
    %3 = vector.load %arg1[%c0_2, %c0_3, %c0_4] : memref<8x8x128xf32, #tpu.memory_space<vmem>>, vector<1x8x128xf32>
    %4 = vector.shape_cast %3 : vector<1x8x128xf32> to vector<8x128xf32>
    %cst_5 = arith.constant dense<0.000000e+00> : vector<8x128xf32>
    %5 = tpu.matmul %1, %0, %cst_5 {dimension_numbers = #tpu.dot_dimension_numbers<[1], [0], [0], [1], [0, 0, 1, 1], [], []>} : vector<8x32xf32>, vector<32x128xf32>, vector<8x128xf32> -> vector<8x128xf32>
    %6 = arith.addf %4, %5 : vector<8x128xf32>
    %7 = arith.negf %6 : vector<8x128xf32>
    %8 = math.exp %7 : vector<8x128xf32>
    %cst_6 = arith.constant 1.000000e+00 : f32
    %9 = vector.broadcast %cst_6 : f32 to vector<8x128xf32>
    %10 = arith.addf %9, %8 : vector<8x128xf32>
    %11 = arith.divf %9, %10 : vector<8x128xf32>
    %12 = vector.extract_strided_slice %11 {offsets = [0, 0], sizes = [8, 32], strides = [1, 1]} : vector<8x128xf32> to vector<8x32xf32>
    %13 = vector.extract_strided_slice %11 {offsets = [0, 32], sizes = [8, 32], strides = [1, 1]} : vector<8x128xf32> to vector<8x32xf32>
    %14 = vector.extract_strided_slice %11 {offsets = [0, 96], sizes = [8, 32], strides = [1, 1]} : vector<8x128xf32> to vector<8x32xf32>
    %15 = vector.extract_strided_slice %6 {offsets = [0, 64], sizes = [8, 32], strides = [1, 1]} : vector<8x128xf32> to vector<8x32xf32>
    %16 = math.tanh %15 : vector<8x32xf32>
    %17 = arith.mulf %13, %2 : vector<8x32xf32>
    %18 = arith.mulf %12, %16 : vector<8x32xf32>
    %19 = arith.addf %17, %18 : vector<8x32xf32>
    %20 = math.tanh %19 : vector<8x32xf32>
    %21 = arith.mulf %14, %20 : vector<8x32xf32>
    %c0_7 = arith.constant 0 : index
    %c0_8 = arith.constant 0 : index
    %c0_9 = arith.constant 0 : index
    %22 = vector.load %arg3[%c0_7, %c0_8, %c0_9] : memref<8x8x32xf32, #tpu.memory_space<vmem>>, vector<1x8x32xf32>
    %23 = vector.shape_cast %22 : vector<1x8x32xf32> to vector<8x32xf32>
    %24 = vector.shape_cast %21 : vector<8x32xf32> to vector<1x8x32xf32>
    tpu.vector_store %arg3[%c0_7, %c0_8, %c0_9], %24 {strides = array<i32>} : memref<8x8x32xf32, #tpu.memory_space<vmem>>, vector<1x8x32xf32>,
    %c1 = arith.constant 1 : index
    %c0_10 = arith.constant 0 : index
    %c0_11 = arith.constant 0 : index
    %25 = vector.load %arg1[%c1, %c0_10, %c0_11] : memref<8x8x128xf32, #tpu.memory_space<vmem>>, vector<1x8x128xf32>
    %26 = vector.shape_cast %25 : vector<1x8x128xf32> to vector<8x128xf32>
    %cst_12 = arith.constant dense<0.000000e+00> : vector<8x128xf32>
    %27 = tpu.matmul %21, %0, %cst_12 {dimension_numbers = #tpu.dot_dimension_numbers<[1], [0], [0], [1], [0, 0, 1, 1], [], []>} : vector<8x32xf32>, vector<32x128xf32>, vector<8x128xf32> -> vector<8x128xf32>
    %28 = arith.addf %26, %27 : vector<8x128xf32>
    %29 = arith.negf %28 : vector<8x128xf32>
    %30 = math.exp %29 : vector<8x128xf32>
    %cst_13 = arith.constant 1.000000e+00 : f32
    %31 = vector.broadcast %cst_13 : f32 to vector<8x128xf32>
    %32 = arith.addf %31, %30 : vector<8x128xf32>
    %33 = arith.divf %31, %32 : vector<8x128xf32>
    %34 = vector.extract_strided_slice %33 {offsets = [0, 0], sizes = [8, 32], strides = [1, 1]} : vector<8x128xf32> to vector<8x32xf32>
    %35 = vector.extract_strided_slice %33 {offsets = [0, 32], sizes = [8, 32], strides = [1, 1]} : vector<8x128xf32> to vector<8x32xf32>
    %36 = vector.extract_strided_slice %33 {offsets = [0, 96], sizes = [8, 32], strides = [1, 1]} : vector<8x128xf32> to vector<8x32xf32>
    %37 = vector.extract_strided_slice %28 {offsets = [0, 64], sizes = [8, 32], strides = [1, 1]} : vector<8x128xf32> to vector<8x32xf32>
    %38 = math.tanh %37 : vector<8x32xf32>
    %39 = arith.mulf %35, %19 : vector<8x32xf32>
    %40 = arith.mulf %34, %38 : vector<8x32xf32>
    %41 = arith.addf %39, %40 : vector<8x32xf32>
    %42 = math.tanh %41 : vector<8x32xf32>
    %43 = arith.mulf %36, %42 : vector<8x32xf32>
    %c1_14 = arith.constant 1 : index
    %c0_15 = arith.constant 0 : index
    %c0_16 = arith.constant 0 : index
    %44 = vector.load %arg3[%c1_14, %c0_15, %c0_16] : memref<8x8x32xf32, #tpu.memory_space<vmem>>, vector<1x8x32xf32>
    %45 = vector.shape_cast %44 : vector<1x8x32xf32> to vector<8x32xf32>
    %46 = vector.shape_cast %43 : vector<8x32xf32> to vector<1x8x32xf32>
    tpu.vector_store %arg3[%c1_14, %c0_15, %c0_16], %46 {strides = array<i32>} : memref<8x8x32xf32, #tpu.memory_space<vmem>>, vector<1x8x32xf32>,
    %c2 = arith.constant 2 : index
    %c0_17 = arith.constant 0 : index
    %c0_18 = arith.constant 0 : index
    %47 = vector.load %arg1[%c2, %c0_17, %c0_18] : memref<8x8x128xf32, #tpu.memory_space<vmem>>, vector<1x8x128xf32>
    %48 = vector.shape_cast %47 : vector<1x8x128xf32> to vector<8x128xf32>
    %cst_19 = arith.constant dense<0.000000e+00> : vector<8x128xf32>
    %49 = tpu.matmul %43, %0, %cst_19 {dimension_numbers = #tpu.dot_dimension_numbers<[1], [0], [0], [1], [0, 0, 1, 1], [], []>} : vector<8x32xf32>, vector<32x128xf32>, vector<8x128xf32> -> vector<8x128xf32>
    %50 = arith.addf %48, %49 : vector<8x128xf32>
    %51 = arith.negf %50 : vector<8x128xf32>
    %52 = math.exp %51 : vector<8x128xf32>
    %cst_20 = arith.constant 1.000000e+00 : f32
    %53 = vector.broadcast %cst_20 : f32 to vector<8x128xf32>
    %54 = arith.addf %53, %52 : vector<8x128xf32>
    %55 = arith.divf %53, %54 : vector<8x128xf32>
    %56 = vector.extract_strided_slice %55 {offsets = [0, 0], sizes = [8, 32], strides = [1, 1]} : vector<8x128xf32> to vector<8x32xf32>
    %57 = vector.extract_strided_slice %55 {offsets = [0, 32], sizes = [8, 32], strides = [1, 1]} : vector<8x128xf32> to vector<8x32xf32>
    %58 = vector.extract_strided_slice %55 {offsets = [0, 96], sizes = [8, 32], strides = [1, 1]} : vector<8x128xf32> to vector<8x32xf32>
    %59 = vector.extract_strided_slice %50 {offsets = [0, 64], sizes = [8, 32], strides = [1, 1]} : vector<8x128xf32> to vector<8x32xf32>
    %60 = math.tanh %59 : vector<8x32xf32>
    %61 = arith.mulf %57, %41 : vector<8x32xf32>
    %62 = arith.mulf %56, %60 : vector<8x32xf32>
    %63 = arith.addf %61, %62 : vector<8x32xf32>
    %64 = math.tanh %63 : vector<8x32xf32>
    %65 = arith.mulf %58, %64 : vector<8x32xf32>
    %c2_21 = arith.constant 2 : index
    %c0_22 = arith.constant 0 : index
    %c0_23 = arith.constant 0 : index
    %66 = vector.load %arg3[%c2_21, %c0_22, %c0_23] : memref<8x8x32xf32, #tpu.memory_space<vmem>>, vector<1x8x32xf32>
    %67 = vector.shape_cast %66 : vector<1x8x32xf32> to vector<8x32xf32>
    %68 = vector.shape_cast %65 : vector<8x32xf32> to vector<1x8x32xf32>
    tpu.vector_store %arg3[%c2_21, %c0_22, %c0_23], %68 {strides = array<i32>} : memref<8x8x32xf32, #tpu.memory_space<vmem>>, vector<1x8x32xf32>,
    %c3 = arith.constant 3 : index
    %c0_24 = arith.constant 0 : index
    %c0_25 = arith.constant 0 : index
    %69 = vector.load %arg1[%c3, %c0_24, %c0_25] : memref<8x8x128xf32, #tpu.memory_space<vmem>>, vector<1x8x128xf32>
    %70 = vector.shape_cast %69 : vector<1x8x128xf32> to vector<8x128xf32>
    %cst_26 = arith.constant dense<0.000000e+00> : vector<8x128xf32>
    %71 = tpu.matmul %65, %0, %cst_26 {dimension_numbers = #tpu.dot_dimension_numbers<[1], [0], [0], [1], [0, 0, 1, 1], [], []>} : vector<8x32xf32>, vector<32x128xf32>, vector<8x128xf32> -> vector<8x128xf32>
    %72 = arith.addf %70, %71 : vector<8x128xf32>
    %73 = arith.negf %72 : vector<8x128xf32>
    %74 = math.exp %73 : vector<8x128xf32>
    %cst_27 = arith.constant 1.000000e+00 : f32
    %75 = vector.broadcast %cst_27 : f32 to vector<8x128xf32>
    %76 = arith.addf %75, %74 : vector<8x128xf32>
    %77 = arith.divf %75, %76 : vector<8x128xf32>
    %78 = vector.extract_strided_slice %77 {offsets = [0, 0], sizes = [8, 32], strides = [1, 1]} : vector<8x128xf32> to vector<8x32xf32>
    %79 = vector.extract_strided_slice %77 {offsets = [0, 32], sizes = [8, 32], strides = [1, 1]} : vector<8x128xf32> to vector<8x32xf32>
    %80 = vector.extract_strided_slice %77 {offsets = [0, 96], sizes = [8, 32], strides = [1, 1]} : vector<8x128xf32> to vector<8x32xf32>
    %81 = vector.extract_strided_slice %72 {offsets = [0, 64], sizes = [8, 32], strides = [1, 1]} : vector<8x128xf32> to vector<8x32xf32>
    %82 = math.tanh %81 : vector<8x32xf32>
    %83 = arith.mulf %79, %63 : vector<8x32xf32>
    %84 = arith.mulf %78, %82 : vector<8x32xf32>
    %85 = arith.addf %83, %84 : vector<8x32xf32>
    %86 = math.tanh %85 : vector<8x32xf32>
    %87 = arith.mulf %80, %86 : vector<8x32xf32>
    %c3_28 = arith.constant 3 : index
    %c0_29 = arith.constant 0 : index
    %c0_30 = arith.constant 0 : index
    %88 = vector.load %arg3[%c3_28, %c0_29, %c0_30] : memref<8x8x32xf32, #tpu.memory_space<vmem>>, vector<1x8x32xf32>
    %89 = vector.shape_cast %88 : vector<1x8x32xf32> to vector<8x32xf32>
    %90 = vector.shape_cast %87 : vector<8x32xf32> to vector<1x8x32xf32>
    tpu.vector_store %arg3[%c3_28, %c0_29, %c0_30], %90 {strides = array<i32>} : memref<8x8x32xf32, #tpu.memory_space<vmem>>, vector<1x8x32xf32>,
    %c4 = arith.constant 4 : index
    %c0_31 = arith.constant 0 : index
    %c0_32 = arith.constant 0 : index
    %91 = vector.load %arg1[%c4, %c0_31, %c0_32] : memref<8x8x128xf32, #tpu.memory_space<vmem>>, vector<1x8x128xf32>
    %92 = vector.shape_cast %91 : vector<1x8x128xf32> to vector<8x128xf32>
    %cst_33 = arith.constant dense<0.000000e+00> : vector<8x128xf32>
    %93 = tpu.matmul %87, %0, %cst_33 {dimension_numbers = #tpu.dot_dimension_numbers<[1], [0], [0], [1], [0, 0, 1, 1], [], []>} : vector<8x32xf32>, vector<32x128xf32>, vector<8x128xf32> -> vector<8x128xf32>
    %94 = arith.addf %92, %93 : vector<8x128xf32>
    %95 = arith.negf %94 : vector<8x128xf32>
    %96 = math.exp %95 : vector<8x128xf32>
    %cst_34 = arith.constant 1.000000e+00 : f32
    %97 = vector.broadcast %cst_34 : f32 to vector<8x128xf32>
    %98 = arith.addf %97, %96 : vector<8x128xf32>
    %99 = arith.divf %97, %98 : vector<8x128xf32>
    %100 = vector.extract_strided_slice %99 {offsets = [0, 0], sizes = [8, 32], strides = [1, 1]} : vector<8x128xf32> to vector<8x32xf32>
    %101 = vector.extract_strided_slice %99 {offsets = [0, 32], sizes = [8, 32], strides = [1, 1]} : vector<8x128xf32> to vector<8x32xf32>
    %102 = vector.extract_strided_slice %99 {offsets = [0, 96], sizes = [8, 32], strides = [1, 1]} : vector<8x128xf32> to vector<8x32xf32>
    %103 = vector.extract_strided_slice %94 {offsets = [0, 64], sizes = [8, 32], strides = [1, 1]} : vector<8x128xf32> to vector<8x32xf32>
    %104 = math.tanh %103 : vector<8x32xf32>
    %105 = arith.mulf %101, %85 : vector<8x32xf32>
    %106 = arith.mulf %100, %104 : vector<8x32xf32>
    %107 = arith.addf %105, %106 : vector<8x32xf32>
    %108 = math.tanh %107 : vector<8x32xf32>
    %109 = arith.mulf %102, %108 : vector<8x32xf32>
    %c4_35 = arith.constant 4 : index
    %c0_36 = arith.constant 0 : index
    %c0_37 = arith.constant 0 : index
    %110 = vector.load %arg3[%c4_35, %c0_36, %c0_37] : memref<8x8x32xf32, #tpu.memory_space<vmem>>, vector<1x8x32xf32>
    %111 = vector.shape_cast %110 : vector<1x8x32xf32> to vector<8x32xf32>
    %112 = vector.shape_cast %109 : vector<8x32xf32> to vector<1x8x32xf32>
    tpu.vector_store %arg3[%c4_35, %c0_36, %c0_37], %112 {strides = array<i32>} : memref<8x8x32xf32, #tpu.memory_space<vmem>>, vector<1x8x32xf32>,
    %c5 = arith.constant 5 : index
    %c0_38 = arith.constant 0 : index
    %c0_39 = arith.constant 0 : index
    %113 = vector.load %arg1[%c5, %c0_38, %c0_39] : memref<8x8x128xf32, #tpu.memory_space<vmem>>, vector<1x8x128xf32>
    %114 = vector.shape_cast %113 : vector<1x8x128xf32> to vector<8x128xf32>
    %cst_40 = arith.constant dense<0.000000e+00> : vector<8x128xf32>
    %115 = tpu.matmul %109, %0, %cst_40 {dimension_numbers = #tpu.dot_dimension_numbers<[1], [0], [0], [1], [0, 0, 1, 1], [], []>} : vector<8x32xf32>, vector<32x128xf32>, vector<8x128xf32> -> vector<8x128xf32>
    %116 = arith.addf %114, %115 : vector<8x128xf32>
    %117 = arith.negf %116 : vector<8x128xf32>
    %118 = math.exp %117 : vector<8x128xf32>
    %cst_41 = arith.constant 1.000000e+00 : f32
    %119 = vector.broadcast %cst_41 : f32 to vector<8x128xf32>
    %120 = arith.addf %119, %118 : vector<8x128xf32>
    %121 = arith.divf %119, %120 : vector<8x128xf32>
    %122 = vector.extract_strided_slice %121 {offsets = [0, 0], sizes = [8, 32], strides = [1, 1]} : vector<8x128xf32> to vector<8x32xf32>
    %123 = vector.extract_strided_slice %121 {offsets = [0, 32], sizes = [8, 32], strides = [1, 1]} : vector<8x128xf32> to vector<8x32xf32>
    %124 = vector.extract_strided_slice %121 {offsets = [0, 96], sizes = [8, 32], strides = [1, 1]} : vector<8x128xf32> to vector<8x32xf32>
    %125 = vector.extract_strided_slice %116 {offsets = [0, 64], sizes = [8, 32], strides = [1, 1]} : vector<8x128xf32> to vector<8x32xf32>
    %126 = math.tanh %125 : vector<8x32xf32>
    %127 = arith.mulf %123, %107 : vector<8x32xf32>
    %128 = arith.mulf %122, %126 : vector<8x32xf32>
    %129 = arith.addf %127, %128 : vector<8x32xf32>
    %130 = math.tanh %129 : vector<8x32xf32>
    %131 = arith.mulf %124, %130 : vector<8x32xf32>
    %c5_42 = arith.constant 5 : index
    %c0_43 = arith.constant 0 : index
    %c0_44 = arith.constant 0 : index
    %132 = vector.load %arg3[%c5_42, %c0_43, %c0_44] : memref<8x8x32xf32, #tpu.memory_space<vmem>>, vector<1x8x32xf32>
    %133 = vector.shape_cast %132 : vector<1x8x32xf32> to vector<8x32xf32>
    %134 = vector.shape_cast %131 : vector<8x32xf32> to vector<1x8x32xf32>
    tpu.vector_store %arg3[%c5_42, %c0_43, %c0_44], %134 {strides = array<i32>} : memref<8x8x32xf32, #tpu.memory_space<vmem>>, vector<1x8x32xf32>,
    %c6 = arith.constant 6 : index
    %c0_45 = arith.constant 0 : index
    %c0_46 = arith.constant 0 : index
    %135 = vector.load %arg1[%c6, %c0_45, %c0_46] : memref<8x8x128xf32, #tpu.memory_space<vmem>>, vector<1x8x128xf32>
    %136 = vector.shape_cast %135 : vector<1x8x128xf32> to vector<8x128xf32>
    %cst_47 = arith.constant dense<0.000000e+00> : vector<8x128xf32>
    %137 = tpu.matmul %131, %0, %cst_47 {dimension_numbers = #tpu.dot_dimension_numbers<[1], [0], [0], [1], [0, 0, 1, 1], [], []>} : vector<8x32xf32>, vector<32x128xf32>, vector<8x128xf32> -> vector<8x128xf32>
    %138 = arith.addf %136, %137 : vector<8x128xf32>
    %139 = arith.negf %138 : vector<8x128xf32>
    %140 = math.exp %139 : vector<8x128xf32>
    %cst_48 = arith.constant 1.000000e+00 : f32
    %141 = vector.broadcast %cst_48 : f32 to vector<8x128xf32>
    %142 = arith.addf %141, %140 : vector<8x128xf32>
    %143 = arith.divf %141, %142 : vector<8x128xf32>
    %144 = vector.extract_strided_slice %143 {offsets = [0, 0], sizes = [8, 32], strides = [1, 1]} : vector<8x128xf32> to vector<8x32xf32>
    %145 = vector.extract_strided_slice %143 {offsets = [0, 32], sizes = [8, 32], strides = [1, 1]} : vector<8x128xf32> to vector<8x32xf32>
    %146 = vector.extract_strided_slice %143 {offsets = [0, 96], sizes = [8, 32], strides = [1, 1]} : vector<8x128xf32> to vector<8x32xf32>
    %147 = vector.extract_strided_slice %138 {offsets = [0, 64], sizes = [8, 32], strides = [1, 1]} : vector<8x128xf32> to vector<8x32xf32>
    %148 = math.tanh %147 : vector<8x32xf32>
    %149 = arith.mulf %145, %129 : vector<8x32xf32>
    %150 = arith.mulf %144, %148 : vector<8x32xf32>
    %151 = arith.addf %149, %150 : vector<8x32xf32>
    %152 = math.tanh %151 : vector<8x32xf32>
    %153 = arith.mulf %146, %152 : vector<8x32xf32>
    %c6_49 = arith.constant 6 : index
    %c0_50 = arith.constant 0 : index
    %c0_51 = arith.constant 0 : index
    %154 = vector.load %arg3[%c6_49, %c0_50, %c0_51] : memref<8x8x32xf32, #tpu.memory_space<vmem>>, vector<1x8x32xf32>
    %155 = vector.shape_cast %154 : vector<1x8x32xf32> to vector<8x32xf32>
    %156 = vector.shape_cast %153 : vector<8x32xf32> to vector<1x8x32xf32>
    tpu.vector_store %arg3[%c6_49, %c0_50, %c0_51], %156 {strides = array<i32>} : memref<8x8x32xf32, #tpu.memory_space<vmem>>, vector<1x8x32xf32>,
    %c7 = arith.constant 7 : index
    %c0_52 = arith.constant 0 : index
    %c0_53 = arith.constant 0 : index
    %157 = vector.load %arg1[%c7, %c0_52, %c0_53] : memref<8x8x128xf32, #tpu.memory_space<vmem>>, vector<1x8x128xf32>
    %158 = vector.shape_cast %157 : vector<1x8x128xf32> to vector<8x128xf32>
    %cst_54 = arith.constant dense<0.000000e+00> : vector<8x128xf32>
    %159 = tpu.matmul %153, %0, %cst_54 {dimension_numbers = #tpu.dot_dimension_numbers<[1], [0], [0], [1], [0, 0, 1, 1], [], []>} : vector<8x32xf32>, vector<32x128xf32>, vector<8x128xf32> -> vector<8x128xf32>
    %160 = arith.addf %158, %159 : vector<8x128xf32>
    %161 = arith.negf %160 : vector<8x128xf32>
    %162 = math.exp %161 : vector<8x128xf32>
    %cst_55 = arith.constant 1.000000e+00 : f32
    %163 = vector.broadcast %cst_55 : f32 to vector<8x128xf32>
    %164 = arith.addf %163, %162 : vector<8x128xf32>
    %165 = arith.divf %163, %164 : vector<8x128xf32>
    %166 = vector.extract_strided_slice %165 {offsets = [0, 0], sizes = [8, 32], strides = [1, 1]} : vector<8x128xf32> to vector<8x32xf32>
    %167 = vector.extract_strided_slice %165 {offsets = [0, 32], sizes = [8, 32], strides = [1, 1]} : vector<8x128xf32> to vector<8x32xf32>
    %168 = vector.extract_strided_slice %165 {offsets = [0, 96], sizes = [8, 32], strides = [1, 1]} : vector<8x128xf32> to vector<8x32xf32>
    %169 = vector.extract_strided_slice %160 {offsets = [0, 64], sizes = [8, 32], strides = [1, 1]} : vector<8x128xf32> to vector<8x32xf32>
    %170 = math.tanh %169 : vector<8x32xf32>
    %171 = arith.mulf %167, %151 : vector<8x32xf32>
    %172 = arith.mulf %166, %170 : vector<8x32xf32>
    %173 = arith.addf %171, %172 : vector<8x32xf32>
    %174 = math.tanh %173 : vector<8x32xf32>
    %175 = arith.mulf %168, %174 : vector<8x32xf32>
    %c7_56 = arith.constant 7 : index
    %c0_57 = arith.constant 0 : index
    %c0_58 = arith.constant 0 : index
    %176 = vector.load %arg3[%c7_56, %c0_57, %c0_58] : memref<8x8x32xf32, #tpu.memory_space<vmem>>, vector<1x8x32xf32>
    %177 = vector.shape_cast %176 : vector<1x8x32xf32> to vector<8x32xf32>
    %178 = vector.shape_cast %175 : vector<8x32xf32> to vector<1x8x32xf32>
    tpu.vector_store %arg3[%c7_56, %c0_57, %c0_58], %178 {strides = array<i32>} : memref<8x8x32xf32, #tpu.memory_space<vmem>>, vector<1x8x32xf32>,
    %c0_59 = arith.constant 0 : index
    %c0_60 = arith.constant 0 : index
    %179 = vector.load %arg4[%c0_59, %c0_60] : memref<8x32xf32, #tpu.memory_space<vmem>>, vector<8x32xf32>
    tpu.vector_store %arg4[%c0_59, %c0_60], %173 {strides = array<i32>} : memref<8x32xf32, #tpu.memory_space<vmem>>, vector<8x32xf32>,
    return
  }
  func.func @transform_0(%arg0: i32) -> (i32, i32, i32) {
    %c0_i32 = arith.constant 0 : i32
    %c0_i32_0 = arith.constant 0 : i32
    %c0_i32_1 = arith.constant 0 : i32
    return %c0_i32, %arg0, %c0_i32_0 : i32, i32, i32
  }
  func.func @transform_1(%arg0: i32) -> (i32, i32) {
    %c0_i32 = arith.constant 0 : i32
    %c0_i32_0 = arith.constant 0 : i32
    %c0_i32_1 = arith.constant 0 : i32
    return %c0_i32, %c0_i32_0 : i32, i32
  }
  func.func @transform_2(%arg0: i32) -> (i32, i32, i32) {
    %c0_i32 = arith.constant 0 : i32
    %c0_i32_0 = arith.constant 0 : i32
    %c0_i32_1 = arith.constant 0 : i32
    return %c0_i32, %arg0, %c0_i32_0 : i32, i32, i32
  }
  func.func @transform_3(%arg0: i32) -> (i32, i32) {
    %c0_i32 = arith.constant 0 : i32
    %c0_i32_0 = arith.constant 0 : i32
    return %arg0, %c0_i32 : i32, i32
  }
}

</mosaic_0001>

<bundles_post_ra>
// kernel: tpu_custom_call.1
= control target key start
LH: loop header
LB: loop body
LE: loop exit
PB: predicated region body
PF: predicated region fallthrough
CT: control target
= control target key end

     0   :  { %9 = vsyncpa [#allocation3], 0  ;;  %s928_s0 = inlined_call_operand.hbm [shape: f32[8,8,128], index: 0, kind: input, shape index: {}]   ;;  %s929_s1 = inlined_call_operand.hbm [shape: f32[32,128], index: 1, kind: input, shape index: {}]   ;;  %s930_s2 = inlined_call_operand.hbm [shape: f32[8,8,32], index: 2, kind: output, shape index: {0}]   ;;  %s931_s3 = inlined_call_operand.hbm [shape: f32[8,32], index: 3, kind: output, shape index: {1}]  }
   0x1   :  { %10 = vsyncpa [#allocation6], 0 }
   0x2   :  { %11 = vsyncpa [#allocation4], 0 }
   0x3   :  { %12 = vsyncpa [#allocation9], 0  ;;  %s17_s14 = sshll.u32 %s928_s0, 4  ;;  %s829_s15 = smov [#allocation2]   ;;  %s18_s14 = int_to_ptr.hbm [resolvable:$true] %s17_s14 }
   0x4   :  { %s19_s16 = sshll.u32 %s829_s15, 4  ;;  %s30_s19 = sshll.u32 %s929_s1, 4  ;;  %s20_s16 = int_to_ptr.vmem [resolvable:$true] %s19_s16  ;;  %s31_s19 = int_to_ptr.hbm [resolvable:$true] %s30_s19 }
   0x5   :  { %s830_s20 = smov 128   ;;  %s831_s21 = smov 8  }
   0x6   :  { %25 = dma.hbm_to_vmem [thread:$0]  %s18_s14, 1024, %s20_s16, [#allocation3], %s830_s20, %s830_s20, %s831_s21  }
   0x7   :  { %s832_s22 = smov [#allocation5]  }
   0x8   :  { %s32_s23 = sshll.u32 %s832_s22, 4  ;;  %s33_s23 = int_to_ptr.vmem [resolvable:$true] %s32_s23 }
   0x9   :  { %38 = dma.hbm_to_vmem [thread:$0]  %s31_s19, 512, %s33_s23, [#allocation6], %s830_s20, %s830_s20, %s831_s21  }
   0xa   :  { %821 = dma.done.wait [#allocation3], 1024  }
   0xb   :  { %822 = vsyncadd [#allocation3], 4294966272 }
   0xc   :  { %823 = dma.done.wait [#allocation6], 512  }
   0xd   :  { %824 = vsyncadd [#allocation6], 4294966784  ;;  %v50_v0 = vld [vmem:[#allocation5 + $0x18] sm:$0xff]  ;;  %v49_v1 = vld [vmem:[#allocation5 + $0x10] sm:$0xff]  ;;  %v833_v4 = vmov 0.0   ;;  %s834_s0 = smov 64  }
   0xe   :  { %68 = vmatpush.msra.mxu0 %v50_v0  ;;  %135 = vmatpush.msra.mxu1 %v50_v0  ;;  %v48_v2 = vld [vmem:[#allocation5 + $0x8] sm:$0xff]  ;;  %v47_v3 = vld [vmem:[#allocation5] sm:$0xff]  ;;  %s835_s1 = smov 32   ;;  %vm52_vm4 = vcmask 261120   ;;  %v188_v57 = vld [vmem:[#allocation2 + $0x10] sm:$0xff]  ;;  %s836_s24 = smov 96  }
   0xf   :  { %203 = vmatpush.msra.mxu2 %v50_v0  ;;  %271 = vmatpush.msra.mxu3 %v50_v0  ;;  %v51_v5 = vld [vmem:[#allocation2] sm:$0xff]  ;;  %v120_v31 = vld [vmem:[#allocation2 + $0x8] sm:$0xff]  ;;  %s837_s25 = smov [#allocation8]   ;;  %s620_s29 = sshll.u32 %s931_s3, 4  ;;  %s621_s29 = int_to_ptr.hbm [resolvable:$true] %s620_s29 }
  0x10   :  { %69 = vmatpush.msra.mxu0 %v49_v1  ;;  %136 = vmatpush.msra.mxu1 %v49_v1  ;;  %s618_s26 = sshll.u32 %s837_s25, 4  ;;  %s838_s30 = smov [#allocation7]   ;;  %s619_s26 = int_to_ptr.vmem [resolvable:$true] %s618_s26 }
  0x11   :  { %204 = vmatpush.msra.mxu2 %v49_v1  ;;  %272 = vmatpush.msra.mxu3 %v49_v1  ;;  %s604_s4 = sshll.u32 %s838_s30, 4  ;;  %s606_s7 = sshll.u32 %s930_s2, 4  ;;  %s605_s4 = int_to_ptr.vmem [resolvable:$true] %s604_s4  ;;  %s607_s7 = int_to_ptr.hbm [resolvable:$true] %s606_s7 }
  0x12   :  { %70 = vmatpush.msra.mxu0 %v48_v2  ;;  %137 = vmatpush.msra.mxu1 %v48_v2 }
  0x13   :  { %205 = vmatpush.msra.mxu2 %v48_v2  ;;  %273 = vmatpush.msra.mxu3 %v48_v2 }
  0x14   :  { %71 = vmatpush.msra.mxu0 %v47_v3  ;;  %138 = vmatpush.msra.mxu1 %v47_v3 }
  0x15   :  { %72 = vmatmul.f32.vlgmr.msra.gmra.mxu0 %v833_v4  ;;  %206 = vmatpush.msra.mxu2 %v47_v3 }
  0x16   :  { %274 = vmatpush.msra.mxu3 %v47_v3  ;;  %339 = vmatpush.msrb.mxu0 %v50_v0 }
  0x17   :  { %407 = vmatpush.msrb.mxu1 %v50_v0  ;;  %475 = vmatpush.msrb.mxu2 %v50_v0 }
  0x18   :  { %340 = vmatpush.msrb.mxu0 %v49_v1  ;;  %543 = vmatpush.msrb.mxu3 %v50_v0 }
  0x19   :  { %408 = vmatpush.msrb.mxu1 %v49_v1  ;;  %476 = vmatpush.msrb.mxu2 %v49_v1 }
  0x1a   :  { %341 = vmatpush.msrb.mxu0 %v48_v2  ;;  %544 = vmatpush.msrb.mxu3 %v49_v1 }
  0x1b   :  { %409 = vmatpush.msrb.mxu1 %v48_v2  ;;  %477 = vmatpush.msrb.mxu2 %v48_v2 }
  0x1c   :  { %342 = vmatpush.msrb.mxu0 %v47_v3  ;;  %545 = vmatpush.msrb.mxu3 %v48_v2 }
  0x1d   :  { %410 = vmatpush.msrb.mxu1 %v47_v3  ;;  %478 = vmatpush.msrb.mxu2 %v47_v3 }
  0x1e   :  { %546 = vmatpush.msrb.mxu3 %v47_v3 }
  0x92   :  { %v73_v6 = vpop.f32.mrf.mxu0 }
  0x93   :  { %v76_v7 = vadd.f32 %v73_v6, %v51_v5 }
  0x95   :  { %661 = vtanh.f32 %v76_v7  ;;  %v636_v9 = vmul.f32 -1.442695, %v76_v7 }
  0x97   :  { %663 = vpow2.f32 %v636_v9 }
  0x9b   :  { %v662_v8 = vpop.eup %661 }
  0x9c   :  { %99 = vrot.lane.b32.xlu0 %v662_v8, %s834_s0 }
  0x9d   :  { %v664_v10 = vpop.eup %663 }
  0x9e   :  { %v80_v11 = vadd.f32 1.0, %v664_v10 }
  0xa0   :  { %665 = vrcp.f32 %v80_v11  ;;  %v92_v17 = vand.u32 2147483648, %v80_v11  ;;  %vm86_vm1 = vweird.f32 %v80_v11  ;;  %v90_v18 = vand.u32 2147483647, %v80_v11 }
  0xa2   :  { %v93_v20 = vor.u32 1.1754944e-38, %v92_v17  ;;  %vm91_vm3 = vcmp.eq.f32.partialorder %v90_v18, 8.507059e+37 }
  0xa6   :  { %v666_v12 = vpop.eup %665 }
  0xa7   :  { %v82_v13 = vmul.f32 %v666_v12, %v80_v11  ;;  %vm87_vm0 = vweird.f32 %v666_v12 }
  0xa8   :  { %vm88_vm2 = vmor %vm86_vm1, %vm87_vm0 }
  0xa9   :  { %v83_v14 = vsub.f32 1.0, %v82_v13 }
  0xab   :  { %v84_v15 = vmul.f32 %v666_v12, %v83_v14 }
  0xad   :  { %v85_v16 = vadd.f32 %v666_v12, %v84_v15 }
  0xaf   :  { %v89_v19 = vsel %vm88_vm2, %v666_v12, %v85_v16 }
  0xb0   :  { %v94_v22 = vsel %vm91_vm3, %v93_v20, %v89_v19  ;;  %v256_v19 = vld [vmem:[#allocation2 + $0x18] sm:$0xff] }
  0xb1   :  { %v97_v24 = vmul.f32 0.0, %v94_v22 }
 0x10e   :  { %v100_v21 = vpop.permute.xlu0 %99 }
 0x10f   :  { %v102_v23 = vmul.f32 %v100_v21, %v94_v22 }
 0x111   :  { %104 = vrot.lane.b32.xlu0 %v102_v23, %s835_s1 }
 0x183   :  { %v105_v25 = vpop.permute.xlu0 %104 }
 0x184   :  { %v107_v26 = vadd.f32 %v105_v25, %v97_v24 }
 0x186   :  { %667 = vtanh.f32 %v107_v26 }
 0x18c   :  { %v668_v27 = vpop.eup %667 }
 0x18d   :  { %110 = vrot.lane.b32.xlu1 %v668_v27, %s834_s0 }
 0x1ff   :  { %v111_v28 = vpop.permute.xlu1 %110 }
 0x200   :  { %v113_v29 = vmul.f32 %v111_v28, %v94_v22 }
 0x202   :  { %115 = vrot.lane.b32.xlu1 %v113_v29, %s835_s1 }
 0x274   :  { %v116_v30 = vpop.permute.xlu1 %115 }
 0x275   :  { %118 = vst.msk [vmem:[#allocation7] sm:$0xff] %vm52_vm4, %v116_v30  ;;  %637 = vmatmul.msk.f32.vlgmr.msra.gmra.mxu1 %vm52_vm4, %v116_v30 }
 0x2f2   :  { %v140_v32 = vpop.f32.mrf.mxu1 }
 0x2f3   :  { %v143_v33 = vadd.f32 %v140_v32, %v120_v31 }
 0x2f5   :  { %669 = vtanh.f32 %v143_v33  ;;  %v638_v35 = vmul.f32 -1.442695, %v143_v33 }
 0x2f7   :  { %671 = vpow2.f32 %v638_v35 }
 0x2fb   :  { %v670_v34 = vpop.eup %669 }
 0x2fc   :  { %166 = vrot.lane.b32.xlu2 %v670_v34, %s834_s0 }
 0x2fd   :  { %v672_v36 = vpop.eup %671 }
 0x2fe   :  { %v147_v37 = vadd.f32 1.0, %v672_v36 }
 0x300   :  { %673 = vrcp.f32 %v147_v37  ;;  %v159_v43 = vand.u32 2147483648, %v147_v37  ;;  %vm153_vm6 = vweird.f32 %v147_v37  ;;  %v157_v44 = vand.u32 2147483647, %v147_v37 }
 0x302   :  { %v160_v46 = vor.u32 1.1754944e-38, %v159_v43  ;;  %vm158_vm8 = vcmp.eq.f32.partialorder %v157_v44, 8.507059e+37 }
 0x306   :  { %v674_v38 = vpop.eup %673 }
 0x307   :  { %v149_v39 = vmul.f32 %v674_v38, %v147_v37  ;;  %vm154_vm5 = vweird.f32 %v674_v38 }
 0x308   :  { %vm155_vm7 = vmor %vm153_vm6, %vm154_vm5 }
 0x309   :  { %v150_v40 = vsub.f32 1.0, %v149_v39 }
 0x30b   :  { %v151_v41 = vmul.f32 %v674_v38, %v150_v40 }
 0x30d   :  { %v152_v42 = vadd.f32 %v674_v38, %v151_v41 }
 0x30f   :  { %v156_v45 = vsel %vm155_vm7, %v674_v38, %v152_v42 }
 0x310   :  { %v161_v48 = vsel %vm158_vm8, %v160_v46, %v156_v45  ;;  %v324_v45 = vld [vmem:[#allocation2 + $0x20] sm:$0xff] }
 0x311   :  { %v164_v50 = vmul.f32 %v161_v48, %v107_v26 }
 0x356   :  { %v167_v47 = vpop.permute.xlu2 %166 }
 0x357   :  { %v169_v49 = vmul.f32 %v167_v47, %v161_v48 }
 0x359   :  { %171 = vrot.lane.b32.xlu2 %v169_v49, %s835_s1 }
 0x3b3   :  { %v172_v51 = vpop.permute.xlu2 %171 }
 0x3b4   :  { %v174_v52 = vadd.f32 %v172_v51, %v164_v50 }
 0x3b6   :  { %675 = vtanh.f32 %v174_v52 }
 0x3bc   :  { %v676_v53 = vpop.eup %675 }
 0x3bd   :  { %177 = vrot.lane.b32.xlu0 %v676_v53, %s834_s0 }
 0x42f   :  { %v178_v54 = vpop.permute.xlu0 %177 }
 0x430   :  { %v180_v55 = vmul.f32 %v178_v54, %v161_v48 }
 0x432   :  { %182 = vrot.lane.b32.xlu1 %v180_v55, %s835_s1 }
 0x4a4   :  { %v183_v56 = vpop.permute.xlu1 %182 }
 0x4a5   :  { %186 = vst.msk [vmem:[#allocation7 + $0x8] sm:$0xff] %vm52_vm4, %v183_v56  ;;  %639 = vmatmul.msk.f32.vlgmr.msra.gmra.mxu2 %vm52_vm4, %v183_v56 }
 0x528   :  { %v208_v58 = vpop.f32.mrf.mxu2 }
 0x529   :  { %v211_v59 = vadd.f32 %v208_v58, %v188_v57 }
 0x52b   :  { %677 = vtanh.f32 %v211_v59  ;;  %v640_v61 = vmul.f32 -1.442695, %v211_v59 }
 0x52d   :  { %679 = vpow2.f32 %v640_v61 }
 0x531   :  { %v678_v60 = vpop.eup %677 }
 0x532   :  { %234 = vrot.lane.b32.xlu2 %v678_v60, %s834_s0 }
 0x533   :  { %v680_v62 = vpop.eup %679 }
 0x534   :  { %v215_v63 = vadd.f32 1.0, %v680_v62 }
 0x536   :  { %681 = vrcp.f32 %v215_v63  ;;  %v227_v5 = vand.u32 2147483648, %v215_v63  ;;  %vm221_vm10 = vweird.f32 %v215_v63  ;;  %v225_v6 = vand.u32 2147483647, %v215_v63 }
 0x538   :  { %v228_v8 = vor.u32 1.1754944e-38, %v227_v5  ;;  %vm226_vm12 = vcmp.eq.f32.partialorder %v225_v6, 8.507059e+37 }
 0x53c   :  { %v682_v0 = vpop.eup %681 }
 0x53d   :  { %v217_v1 = vmul.f32 %v682_v0, %v215_v63  ;;  %vm222_vm9 = vweird.f32 %v682_v0 }
 0x53e   :  { %vm223_vm11 = vmor %vm221_vm10, %vm222_vm9 }
 0x53f   :  { %v218_v2 = vsub.f32 1.0, %v217_v1 }
 0x541   :  { %v219_v3 = vmul.f32 %v682_v0, %v218_v2 }
 0x543   :  { %v220_v4 = vadd.f32 %v682_v0, %v219_v3 }
 0x545   :  { %v224_v7 = vsel %vm223_vm11, %v682_v0, %v220_v4 }
 0x546   :  { %v229_v10 = vsel %vm226_vm12, %v228_v8, %v224_v7  ;;  %v392_v7 = vld [vmem:[#allocation2 + $0x28] sm:$0xff] }
 0x547   :  { %v232_v12 = vmul.f32 %v229_v10, %v174_v52 }
 0x58c   :  { %v235_v9 = vpop.permute.xlu2 %234 }
 0x58d   :  { %v237_v11 = vmul.f32 %v235_v9, %v229_v10 }
 0x58f   :  { %239 = vrot.lane.b32.xlu0 %v237_v11, %s835_s1 }
 0x601   :  { %v240_v13 = vpop.permute.xlu0 %239 }
 0x602   :  { %v242_v14 = vadd.f32 %v240_v13, %v232_v12 }
 0x604   :  { %683 = vtanh.f32 %v242_v14 }
 0x60a   :  { %v684_v15 = vpop.eup %683 }
 0x60b   :  { %245 = vrot.lane.b32.xlu1 %v684_v15, %s834_s0 }
 0x67d   :  { %v246_v16 = vpop.permute.xlu1 %245 }
 0x67e   :  { %v248_v17 = vmul.f32 %v246_v16, %v229_v10 }
 0x680   :  { %250 = vrot.lane.b32.xlu2 %v248_v17, %s835_s1 }
 0x6da   :  { %v251_v18 = vpop.permute.xlu2 %250 }
 0x6db   :  { %254 = vst.msk [vmem:[#allocation7 + $0x10] sm:$0xff] %vm52_vm4, %v251_v18  ;;  %641 = vmatmul.msk.f32.vlgmr.msra.gmra.mxu3 %vm52_vm4, %v251_v18 }
 0x75e   :  { %v276_v20 = vpop.f32.mrf.mxu3 }
 0x75f   :  { %v279_v21 = vadd.f32 %v276_v20, %v256_v19 }
 0x761   :  { %685 = vtanh.f32 %v279_v21  ;;  %v642_v23 = vmul.f32 -1.442695, %v279_v21 }
 0x763   :  { %687 = vpow2.f32 %v642_v23 }
 0x767   :  { %v686_v22 = vpop.eup %685 }
 0x768   :  { %302 = vrot.lane.b32.xlu0 %v686_v22, %s834_s0 }
 0x769   :  { %v688_v24 = vpop.eup %687 }
 0x76a   :  { %v283_v25 = vadd.f32 1.0, %v688_v24 }
 0x76c   :  { %689 = vrcp.f32 %v283_v25  ;;  %v295_v31 = vand.u32 2147483648, %v283_v25  ;;  %vm289_vm14 = vweird.f32 %v283_v25  ;;  %v293_v32 = vand.u32 2147483647, %v283_v25 }
 0x76e   :  { %v296_v34 = vor.u32 1.1754944e-38, %v295_v31  ;;  %vm294_vm0 = vcmp.eq.f32.partialorder %v293_v32, 8.507059e+37 }
 0x772   :  { %v690_v26 = vpop.eup %689 }
 0x773   :  { %v285_v27 = vmul.f32 %v690_v26, %v283_v25  ;;  %vm290_vm13 = vweird.f32 %v690_v26 }
 0x774   :  { %vm291_vm15 = vmor %vm289_vm14, %vm290_vm13 }
 0x775   :  { %v286_v28 = vsub.f32 1.0, %v285_v27 }
 0x777   :  { %v287_v29 = vmul.f32 %v690_v26, %v286_v28 }
 0x779   :  { %v288_v30 = vadd.f32 %v690_v26, %v287_v29 }
 0x77b   :  { %v292_v33 = vsel %vm291_vm15, %v690_v26, %v288_v30 }
 0x77c   :  { %v297_v36 = vsel %vm294_vm0, %v296_v34, %v292_v33  ;;  %v460_v33 = vld [vmem:[#allocation2 + $0x30] sm:$0xff] }
 0x77d   :  { %v300_v38 = vmul.f32 %v297_v36, %v242_v14 }
 0x7da   :  { %v303_v35 = vpop.permute.xlu0 %302 }
 0x7db   :  { %v305_v37 = vmul.f32 %v303_v35, %v297_v36 }
 0x7dd   :  { %307 = vrot.lane.b32.xlu1 %v305_v37, %s835_s1 }
 0x84f   :  { %v308_v39 = vpop.permute.xlu1 %307 }
 0x850   :  { %v310_v40 = vadd.f32 %v308_v39, %v300_v38 }
 0x852   :  { %691 = vtanh.f32 %v310_v40 }
 0x858   :  { %v692_v41 = vpop.eup %691 }
 0x859   :  { %313 = vrot.lane.b32.xlu2 %v692_v41, %s834_s0 }
 0x8b3   :  { %v314_v42 = vpop.permute.xlu2 %313 }
 0x8b4   :  { %v316_v43 = vmul.f32 %v314_v42, %v297_v36 }
 0x8b6   :  { %318 = vrot.lane.b32.xlu0 %v316_v43, %s835_s1 }
 0x928   :  { %v319_v44 = vpop.permute.xlu0 %318 }
 0x929   :  { %322 = vst.msk [vmem:[#allocation7 + $0x18] sm:$0xff] %vm52_vm4, %v319_v44  ;;  %643 = vmatmul.msk.f32.vlgmr.msrb.gmra.mxu0 %vm52_vm4, %v319_v44 }
 0x9a6   :  { %v344_v46 = vpop.f32.mrf.mxu0 }
 0x9a7   :  { %v347_v47 = vadd.f32 %v344_v46, %v324_v45 }
 0x9a9   :  { %693 = vtanh.f32 %v347_v47  ;;  %v644_v49 = vmul.f32 -1.442695, %v347_v47 }
 0x9ab   :  { %695 = vpow2.f32 %v644_v49 }
 0x9af   :  { %v694_v48 = vpop.eup %693 }
 0x9b0   :  { %370 = vrot.lane.b32.xlu1 %v694_v48, %s834_s0 }
 0x9b1   :  { %v696_v50 = vpop.eup %695 }
 0x9b2   :  { %v351_v51 = vadd.f32 1.0, %v696_v50 }
 0x9b4   :  { %697 = vrcp.f32 %v351_v51  ;;  %v363_v57 = vand.u32 2147483648, %v351_v51  ;;  %vm357_vm2 = vweird.f32 %v351_v51  ;;  %v361_v58 = vand.u32 2147483647, %v351_v51 }
 0x9b6   :  { %v364_v60 = vor.u32 1.1754944e-38, %v363_v57  ;;  %vm362_vm5 = vcmp.eq.f32.partialorder %v361_v58, 8.507059e+37 }
 0x9ba   :  { %v698_v52 = vpop.eup %697 }
 0x9bb   :  { %v353_v53 = vmul.f32 %v698_v52, %v351_v51  ;;  %vm358_vm1 = vweird.f32 %v698_v52 }
 0x9bc   :  { %vm359_vm3 = vmor %vm357_vm2, %vm358_vm1 }
 0x9bd   :  { %v354_v54 = vsub.f32 1.0, %v353_v53 }
 0x9bf   :  { %v355_v55 = vmul.f32 %v698_v52, %v354_v54 }
 0x9c1   :  { %v356_v56 = vadd.f32 %v698_v52, %v355_v55 }
 0x9c3   :  { %v360_v59 = vsel %vm359_vm3, %v698_v52, %v356_v56 }
 0x9c4   :  { %v365_v62 = vsel %vm362_vm5, %v364_v60, %v360_v59  ;;  %v528_v59 = vld [vmem:[#allocation2 + $0x38] sm:$0xff] }
 0x9c5   :  { %v368_v0 = vmul.f32 %v365_v62, %v310_v40 }
 0xa22   :  { %v371_v61 = vpop.permute.xlu1 %370 }
 0xa23   :  { %v373_v63 = vmul.f32 %v371_v61, %v365_v62 }
 0xa25   :  { %375 = vrot.lane.b32.xlu2 %v373_v63, %s835_s1 }
 0xa7f   :  { %v376_v1 = vpop.permute.xlu2 %375 }
 0xa80   :  { %v378_v2 = vadd.f32 %v376_v1, %v368_v0 }
 0xa82   :  { %699 = vtanh.f32 %v378_v2 }
 0xa88   :  { %v700_v3 = vpop.eup %699 }
 0xa89   :  { %381 = vrot.lane.b32.xlu0 %v700_v3, %s834_s0 }
 0xafb   :  { %v382_v4 = vpop.permute.xlu0 %381 }
 0xafc   :  { %v384_v5 = vmul.f32 %v382_v4, %v365_v62 }
 0xafe   :  { %386 = vrot.lane.b32.xlu1 %v384_v5, %s835_s1 }
 0xb70   :  { %v387_v6 = vpop.permute.xlu1 %386 }
 0xb71   :  { %390 = vst.msk [vmem:[#allocation7 + $0x20] sm:$0xff] %vm52_vm4, %v387_v6  ;;  %645 = vmatmul.msk.f32.vlgmr.msrb.gmra.mxu1 %vm52_vm4, %v387_v6 }
 0xbee   :  { %v412_v8 = vpop.f32.mrf.mxu1 }
 0xbef   :  { %v415_v9 = vadd.f32 %v412_v8, %v392_v7 }
 0xbf1   :  { %701 = vtanh.f32 %v415_v9  ;;  %v646_v11 = vmul.f32 -1.442695, %v415_v9 }
 0xbf3   :  { %703 = vpow2.f32 %v646_v11 }
 0xbf7   :  { %v702_v10 = vpop.eup %701 }
 0xbf8   :  { %438 = vrot.lane.b32.xlu2 %v702_v10, %s834_s0 }
 0xbf9   :  { %v704_v12 = vpop.eup %703 }
 0xbfa   :  { %v419_v13 = vadd.f32 1.0, %v704_v12 }
 0xbfc   :  { %705 = vrcp.f32 %v419_v13  ;;  %v431_v19 = vand.u32 2147483648, %v419_v13  ;;  %vm425_vm7 = vweird.f32 %v419_v13  ;;  %v429_v20 = vand.u32 2147483647, %v419_v13 }
 0xbfe   :  { %v432_v22 = vor.u32 1.1754944e-38, %v431_v19  ;;  %vm430_vm9 = vcmp.eq.f32.partialorder %v429_v20, 8.507059e+37 }
 0xc02   :  { %v706_v14 = vpop.eup %705 }
 0xc03   :  { %v421_v15 = vmul.f32 %v706_v14, %v419_v13  ;;  %vm426_vm6 = vweird.f32 %v706_v14 }
 0xc04   :  { %vm427_vm8 = vmor %vm425_vm7, %vm426_vm6 }
 0xc05   :  { %v422_v16 = vsub.f32 1.0, %v421_v15 }
 0xc07   :  { %v423_v17 = vmul.f32 %v706_v14, %v422_v16 }
 0xc09   :  { %v424_v18 = vadd.f32 %v706_v14, %v423_v17 }
 0xc0b   :  { %v428_v21 = vsel %vm427_vm8, %v706_v14, %v424_v18 }
 0xc0c   :  { %v433_v24 = vsel %vm430_vm9, %v432_v22, %v428_v21 }
 0xc0d   :  { %v436_v26 = vmul.f32 %v433_v24, %v378_v2 }
 0xc52   :  { %v439_v23 = vpop.permute.xlu2 %438 }
 0xc53   :  { %v441_v25 = vmul.f32 %v439_v23, %v433_v24 }
 0xc55   :  { %443 = vrot.lane.b32.xlu0 %v441_v25, %s835_s1 }
 0xcc7   :  { %v444_v27 = vpop.permute.xlu0 %443 }
 0xcc8   :  { %v446_v28 = vadd.f32 %v444_v27, %v436_v26 }
 0xcca   :  { %707 = vtanh.f32 %v446_v28 }
 0xcd0   :  { %v708_v29 = vpop.eup %707 }
 0xcd1   :  { %449 = vrot.lane.b32.xlu1 %v708_v29, %s834_s0 }
 0xd43   :  { %v450_v30 = vpop.permute.xlu1 %449 }
 0xd44   :  { %v452_v31 = vmul.f32 %v450_v30, %v433_v24 }
 0xd46   :  { %454 = vrot.lane.b32.xlu2 %v452_v31, %s835_s1 }
 0xda0   :  { %v455_v32 = vpop.permute.xlu2 %454 }
 0xda1   :  { %458 = vst.msk [vmem:[#allocation7 + $0x28] sm:$0xff] %vm52_vm4, %v455_v32  ;;  %647 = vmatmul.msk.f32.vlgmr.msrb.gmra.mxu2 %vm52_vm4, %v455_v32 }
 0xe24   :  { %v480_v34 = vpop.f32.mrf.mxu2 }
 0xe25   :  { %v483_v35 = vadd.f32 %v480_v34, %v460_v33 }
 0xe27   :  { %709 = vtanh.f32 %v483_v35  ;;  %v648_v37 = vmul.f32 -1.442695, %v483_v35 }
 0xe29   :  { %711 = vpow2.f32 %v648_v37 }
 0xe2d   :  { %v710_v36 = vpop.eup %709 }
 0xe2e   :  { %506 = vrot.lane.b32.xlu0 %v710_v36, %s834_s0 }
 0xe2f   :  { %v712_v38 = vpop.eup %711 }
 0xe30   :  { %v487_v39 = vadd.f32 1.0, %v712_v38 }
 0xe32   :  { %713 = vrcp.f32 %v487_v39  ;;  %v499_v45 = vand.u32 2147483648, %v487_v39  ;;  %vm493_vm11 = vweird.f32 %v487_v39  ;;  %v497_v46 = vand.u32 2147483647, %v487_v39 }
 0xe34   :  { %v500_v48 = vor.u32 1.1754944e-38, %v499_v45  ;;  %vm498_vm13 = vcmp.eq.f32.partialorder %v497_v46, 8.507059e+37 }
 0xe38   :  { %v714_v40 = vpop.eup %713 }
 0xe39   :  { %v489_v41 = vmul.f32 %v714_v40, %v487_v39  ;;  %vm494_vm10 = vweird.f32 %v714_v40 }
 0xe3a   :  { %vm495_vm12 = vmor %vm493_vm11, %vm494_vm10 }
 0xe3b   :  { %v490_v42 = vsub.f32 1.0, %v489_v41 }
 0xe3d   :  { %v491_v43 = vmul.f32 %v714_v40, %v490_v42 }
 0xe3f   :  { %v492_v44 = vadd.f32 %v714_v40, %v491_v43 }
 0xe41   :  { %v496_v47 = vsel %vm495_vm12, %v714_v40, %v492_v44 }
 0xe42   :  { %v501_v50 = vsel %vm498_vm13, %v500_v48, %v496_v47 }
 0xe43   :  { %v504_v52 = vmul.f32 %v501_v50, %v446_v28 }
 0xea0   :  { %v507_v49 = vpop.permute.xlu0 %506 }
 0xea1   :  { %v509_v51 = vmul.f32 %v507_v49, %v501_v50 }
 0xea3   :  { %511 = vrot.lane.b32.xlu1 %v509_v51, %s835_s1 }
 0xf15   :  { %v512_v53 = vpop.permute.xlu1 %511 }
 0xf16   :  { %v514_v54 = vadd.f32 %v512_v53, %v504_v52 }
 0xf18   :  { %715 = vtanh.f32 %v514_v54 }
 0xf1e   :  { %v716_v55 = vpop.eup %715 }
 0xf1f   :  { %517 = vrot.lane.b32.xlu2 %v716_v55, %s834_s0 }
 0xf79   :  { %v518_v56 = vpop.permute.xlu2 %517 }
 0xf7a   :  { %v520_v57 = vmul.f32 %v518_v56, %v501_v50 }
 0xf7c   :  { %522 = vrot.lane.b32.xlu0 %v520_v57, %s835_s1 }
 0xfee   :  { %v523_v58 = vpop.permute.xlu0 %522 }
 0xfef   :  { %526 = vst.msk [vmem:[#allocation7 + $0x30] sm:$0xff] %vm52_vm4, %v523_v58  ;;  %649 = vmatmul.msk.f32.vlgmr.msrb.gmra.mxu3 %vm52_vm4, %v523_v58 }
0x1072   :  { %v548_v60 = vpop.f32.mrf.mxu3 }
0x1073   :  { %v551_v61 = vadd.f32 %v548_v60, %v528_v59 }
0x1075   :  { %717 = vtanh.f32 %v551_v61  ;;  %v650_v63 = vmul.f32 -1.442695, %v551_v61 }
0x1077   :  { %719 = vpow2.f32 %v650_v63 }
0x107b   :  { %v718_v62 = vpop.eup %717 }
0x107c   :  { %574 = vrot.lane.b32.xlu1 %v718_v62, %s834_s0 }
0x107d   :  { %v720_v0 = vpop.eup %719 }
0x107e   :  { %v555_v1 = vadd.f32 1.0, %v720_v0 }
0x1080   :  { %721 = vrcp.f32 %v555_v1  ;;  %v567_v7 = vand.u32 2147483648, %v555_v1  ;;  %vm561_vm15 = vweird.f32 %v555_v1  ;;  %v565_v8 = vand.u32 2147483647, %v555_v1 }
0x1082   :  { %v568_v10 = vor.u32 1.1754944e-38, %v567_v7  ;;  %vm566_vm1 = vcmp.eq.f32.partialorder %v565_v8, 8.507059e+37 }
0x1086   :  { %v722_v2 = vpop.eup %721 }
0x1087   :  { %v557_v3 = vmul.f32 %v722_v2, %v555_v1  ;;  %vm562_vm14 = vweird.f32 %v722_v2 }
0x1088   :  { %vm563_vm0 = vmor %vm561_vm15, %vm562_vm14 }
0x1089   :  { %v558_v4 = vsub.f32 1.0, %v557_v3 }
0x108b   :  { %v559_v5 = vmul.f32 %v722_v2, %v558_v4 }
0x108d   :  { %v560_v6 = vadd.f32 %v722_v2, %v559_v5 }
0x108f   :  { %v564_v9 = vsel %vm563_vm0, %v722_v2, %v560_v6 }
0x1090   :  { %v569_v12 = vsel %vm566_vm1, %v568_v10, %v564_v9 }
0x1091   :  { %v572_v14 = vmul.f32 %v569_v12, %v514_v54 }
0x10ee   :  { %v575_v11 = vpop.permute.xlu1 %574 }
0x10ef   :  { %v577_v13 = vmul.f32 %v575_v11, %v569_v12 }
0x10f1   :  { %579 = vrot.lane.b32.xlu2 %v577_v13, %s835_s1 }
0x114b   :  { %v580_v15 = vpop.permute.xlu2 %579 }
0x114c   :  { %v582_v16 = vadd.f32 %v580_v15, %v572_v14 }
0x114e   :  { %723 = vtanh.f32 %v582_v16  ;;  %596 = vrot.lane.b32.xlu2 %v582_v16, %s836_s24 }
0x1154   :  { %v724_v17 = vpop.eup %723 }
0x1155   :  { %585 = vrot.lane.b32.xlu0 %v724_v17, %s834_s0 }
0x11a8   :  { %v597_v18 = vpop.permute.xlu2 %596 }
0x11a9   :  { %599 = vst.msk [vmem:[#allocation8] sm:$0xff] %vm52_vm4, %v597_v18 }
0x11aa   :  { %623 = dma.vmem_to_hbm [thread:$0]  %s619_s26, 128, %s621_s29, [#allocation9]  }
0x11c7   :  { %v586_v19 = vpop.permute.xlu0 %585 }
0x11c8   :  { %v588_v20 = vmul.f32 %v586_v19, %v569_v12 }
0x11ca   :  { %590 = vrot.lane.b32.xlu1 %v588_v20, %s835_s1 }
0x123c   :  { %v591_v21 = vpop.permute.xlu1 %590 }
0x123d   :  { %594 = vst.msk [vmem:[#allocation7 + $0x38] sm:$0xff] %vm52_vm4, %v591_v21 }
0x123e   :  { %612 = dma.vmem_to_hbm [thread:$0]  %s605_s4, 1024, %s607_s7, [#allocation4], %s830_s20, %s830_s20, %s831_s21  }
0x123f   :  { %825 = dma.done.wait [#allocation4], 1024  }
0x1240   :  { %826 = vsyncadd [#allocation4], 4294966272 }
0x1241   :  { %827 = dma.done.wait [#allocation9], 128  }
0x1242   :  { %828 = vsyncadd [#allocation9], 4294967168 }
0x1243   :  { %632 = vsyncpa [#allocation3], 1 }
0x1244   :  { %633 = vsyncpa [#allocation6], 1 }
0x1245   :  { %634 = vsyncpa [#allocation4], 1 }
0x1246   :  { %635 = vsyncpa [#allocation9], 1 }

</bundles_post_ra>
